<compile_context>
chip_gen: v7x
topology: tpu7x:2x2x1
jax: 0.10.0
libtpu: 0.0.40
codegen_flags: <defaults>
</compile_context>

<pallas_src>
import numpy as np
import jax
import jax.numpy as jnp
from jax.experimental import pallas as pl
from jax.experimental.pallas import tpu as pltpu


# ----------------------------------------------------------------------------- kernel
def fused_deconv_kernel(x_ref, s_ref, b_ref, o_ref):
    # x_ref : (Nb, 1, L)   flattened interior input pixels  x[n, a+1, b+1]
    # s_ref : (16, L)      fused scale, blocked (4t+u, a*(W-2)+b) layout
    # b_ref : (16, L)      fused bias,  same layout
    # o_ref : (Nb, 16, L)  blocked output
    o_ref[...] = x_ref[...] * s_ref[...][None, :, :] + b_ref[...][None, :, :]


# ----------------------------------------------------------------------------- sizing
def _round_up(x, m):
    return ((x + m - 1) // m) * m


def _tpu_config():
    """Physical VMEM per TensorCore and whether the chip is v7x-class (2 TCs)."""
    vmem = 64 << 20                      # conservative default (v7x size)
    try:
        vmem = int(getattr(pltpu.get_tpu_info(), "vmem_capacity_bytes", vmem))
    except Exception:
        pass
    two_cores = False
    try:
        two_cores = "v7" in jax.devices()[0].device_kind.lower()
    except Exception:
        pass
    return vmem, two_cores


def _pick_block_batch(n, L, vmem_bytes, two_cores):
    """Planes per grid step: as large as the VMEM budget allows (amortizes the
    ~0.35us/step overhead); on v7x keep an even number of >=2 steps so both
    TensorCores get equal work.  Non-divisible N is handled by pl.cdiv grids
    (the trailing partial block is padded/dropped by Pallas), not by shrinking nb."""
    lpad = _round_up(max(L, 1), 128)
    # per plane, f32, (8,128)-padded tiles, double-buffered by the pipeline:
    #   input (1, L) -> one (8, lpad) tile ; output (16, L) -> two (8, lpad) tiles
    bytes_per_plane = 4 * (8 + 16) * lpad * 2
    budget = max(min(vmem_bytes // 3, 48 << 20), 4 << 20)
    nb = max(1, min(n, budget // bytes_per_plane))
    if two_cores and n > 1:
        steps = -(-n // nb)
        if steps < 2 or steps % 2:
            steps = max(2, steps + (steps % 2))
            nb = -(-n // steps)
    return int(nb)


# ----------------------------------------------------------------------------- forward
def model_forward(x_nchw, params):
    N, C, H, W = x_nchw.shape
    assert C == 1, "Model is 1->1 channel"
    assert H >= 3 and W >= 4, "input too small for this conv-transpose chain"

    # PyTorch ConvTranspose2d output sizes:
    H1, W1 = H - 2, W - 2                # k=1, s=1, p=1
    H2, W2 = 2 * H1, 2 * W1 - 2          # k=2, s=2, p=(0, 1)
    H3, W3 = 2 * H2 - 1, 2 * W2 + 1      # k=2, s=2, p=(1, 0), output_padding=1

    w1 = params["w1"].reshape(()).astype(jnp.float32)
    b1 = params["b1"].reshape(()).astype(jnp.float32)
    w2 = params["w2"].reshape(2, 2).astype(jnp.float32)
    b2 = params["b2"].reshape(()).astype(jnp.float32)
    w3 = params["w3"].reshape(2, 2).astype(jnp.float32)
    b3 = params["b3"].reshape(()).astype(jnp.float32)

    # --- tiny host prologue: 4x4-periodic fused scale/bias over (r, s) = (i%4, j%4)
    p3 = jnp.array([1, 0, 1, 0], jnp.int32)   # layer-3 kernel row parity
    p2 = jnp.array([0, 1, 1, 0], jnp.int32)   # layer-2 kernel row parity
    q3 = jnp.array([0, 1, 0, 1], jnp.int32)   # layer-3 kernel col parity
    q2 = jnp.array([1, 1, 0, 0], jnp.int32)   # layer-2 kernel col parity
    w3_sel = w3[p3[:, None], q3[None, :]]     # (4, 4)
    w2_sel = w2[p2[:, None], q2[None, :]]     # (4, 4)
    s4 = w1 * w2_sel * w3_sel                 # scale S4[r, s]
    b4 = b3 + w3_sel * (b2 + w2_sel * b1)     # bias  B4[r, s]

    # Blocked layout: i = 4a + t - 1, j = 4b + u - 2  (a,b index the input interior)
    # => r = i%4 = (t+3)%4, s = j%4 = (u+2)%4.  Build the (16, L) kernel constants.
    Hc, Wc = H - 2, W - 2
    L = Hc * Wc
    t_idx = (jnp.arange(4) + 3) % 4
    u_idx = (jnp.arange(4) + 2) % 4
    s16 = s4[t_idx[:, None], u_idx[None, :]].reshape(16)
    b16 = b4[t_idx[:, None], u_idx[None, :]].reshape(16)
    scale_k = jnp.broadcast_to(s16[:, None], (16, L))
    bias_k = jnp.broadcast_to(b16[:, None], (16, L))
    # output_padding column of layer 3 (j = W3-1  <->  u == 2, b == W-3):
    # no kernel tap reaches it -> pure b3.
    last_col = (((jnp.arange(16) % 4) == 2)[:, None]
                & ((jnp.arange(L) % Wc) == (Wc - 1))[None, :])
    scale_k = jnp.where(last_col, 0.0, scale_k).astype(jnp.float32)
    bias_k = jnp.where(last_col, b3, bias_k).astype(jnp.float32)

    # Flattened interior input (only the pixels the fused chain actually reads).
    xc = x_nchw[:, 0, 1:H - 1, 1:W - 1].reshape(N, 1, L).astype(jnp.float32)

    vmem_bytes, two_cores = _tpu_config()
    nb = _pick_block_batch(N, L, vmem_bytes, two_cores)
    vmem_limit = int(min(64 << 20, max(32 << 20, (vmem_bytes * 3) // 5)))

    out_blk = pl.pallas_call(
        fused_deconv_kernel,
        out_shape=jax.ShapeDtypeStruct((N, 16, L), jnp.float32),
        grid=(pl.cdiv(N, nb),),
        in_specs=[
            pl.BlockSpec((nb, 1, L), lambda n: (n, 0, 0)),
            pl.BlockSpec((16, L), lambda n: (0, 0)),    # resident: constant block
            pl.BlockSpec((16, L), lambda n: (0, 0)),    # resident: constant block
        ],
        out_specs=pl.BlockSpec((nb, 16, L), lambda n: (n, 0, 0)),
        compiler_params=pltpu.CompilerParams(
            dimension_semantics=("parallel",),
            vmem_limit_bytes=vmem_limit,
        ),
    )(xc, scale_k, bias_k)

    # Wrapper-side un-permute (pure layout plumbing in XLA):
    #   (N, 4t+u, a*Wc+b) -> (N, 4a+t, 4b+u) -> slice to (N, H3, W3)
    out = out_blk.reshape(N, 4, 4, Hc, Wc).transpose(0, 3, 1, 4, 2)
    out = out.reshape(N, 4 * Hc, 4 * Wc)[:, 1:1 + H3, 2:2 + W3]
    return out.reshape(N, 1, H3, W3)


# ----------------------------------------------------------------------------- reference
def conv_transpose2d_ref(x, w, b, stride, padding, output_padding):
    """Pure numpy reference matching torch.nn.ConvTranspose2d (1->1 channel)."""
    N, _, H, W = x.shape
    kh, kw = w.shape[2], w.shape[3]
    sh, sw = stride
    ph, pw = padding
    oph, opw = output_padding
    Ho = (H - 1) * sh - 2 * ph + kh + oph
    Wo = (W - 1) * sw - 2 * pw + kw + opw
    out = np.full((N, 1, Ho, Wo), float(b[0]), dtype=np.float64)
    for n in range(N):
        for a in range(H):
            for bb in range(W):
                for p in range(kh):
                    for q in range(kw):
                        i = a * sh - ph + p
                        j = bb * sw - pw + q
                        if 0 <= i < Ho and 0 <= j < Wo:
                            out[n, 0, i, j] += x[n, 0, a, bb] * w[0, 0, p, q]
    return out


if __name__ == "__main__":
    key = jax.random.PRNGKey(0)
    k1, k2, k3, k4, k5, k6, kx = jax.random.split(key, 7)

    # Deterministic synthetic parameters (shapes from the module's __init__).
    params = {
        "w1": jax.random.normal(k1, (1, 1, 1, 1), jnp.float32) * 0.5,
        "b1": jax.random.normal(k2, (1,), jnp.float32) * 0.1,
        "w2": jax.random.normal(k3, (1, 1, 2, 2), jnp.float32) * 0.5,
        "b2": jax.random.normal(k4, (1,), jnp.float32) * 0.1,
        "w3": jax.random.normal(k5, (1, 1, 2, 2), jnp.float32) * 0.5,
        "b3": jax.random.normal(k6, (1,), jnp.float32) * 0.1,
    }

    # Small input consistent with the forward pass (NCHW, 1 channel).
    x = jax.random.normal(kx, (2, 1, 8, 8), jnp.float32)

    out = jax.block_until_ready(model_forward(x, params))

    # Reference chain (numpy float64, same semantics as PyTorch ConvTranspose2d).
    xn = np.asarray(x, dtype=np.float64)
    v1 = conv_transpose2d_ref(xn, np.asarray(params["w1"], np.float64),
                              np.asarray(params["b1"], np.float64),
                              (1, 1), (1, 1), (0, 0))
    v2 = conv_transpose2d_ref(v1, np.asarray(params["w2"], np.float64),
                              np.asarray(params["b2"], np.float64),
                              (2, 2), (0, 1), (0, 0))
    v3 = conv_transpose2d_ref(v2, np.asarray(params["w3"], np.float64),
                              np.asarray(params["b3"], np.float64),
                              (2, 2), (1, 0), (1, 1))

    assert out.shape == v3.shape, (out.shape, v3.shape)
    np.testing.assert_allclose(np.asarray(out, np.float64), v3, rtol=1e-5, atol=1e-5)
    print("KERNEL_OK")
</pallas_src>

<mosaic_0001>
module attributes {stable_mosaic.version = 11 : i64} {
  func.func @fused_deconv_kernel(%arg0: i32, %arg1: memref<2x1x36xf32, #tpu.memory_space<vmem>>, %arg2: memref<16x36xf32, #tpu.memory_space<vmem>>, %arg3: memref<16x36xf32, #tpu.memory_space<vmem>>, %arg4: memref<2x16x36xf32, #tpu.memory_space<vmem>>) attributes {dimension_semantics = [#tpu.dimension_semantics<parallel>], iteration_bounds = array<i64: 1>, scalar_prefetch = 0 : i64, scratch_operands = 0 : i64, tpu.core_type = #tpu.core_type<tc>, window_params = [{transform_indices = @transform_0, window_bounds = array<i64: 2, 1, 36>}, {pipeline_mode = #tpu.pipeline_mode<synchronous>, transform_indices = @transform_1, window_bounds = array<i64: 16, 36>}, {pipeline_mode = #tpu.pipeline_mode<synchronous>, transform_indices = @transform_2, window_bounds = array<i64: 16, 36>}, {transform_indices = @transform_3, window_bounds = array<i64: 2, 16, 36>}]} {
    %c0 = arith.constant 0 : index
    %c0_0 = arith.constant 0 : index
    %c0_1 = arith.constant 0 : index
    %0 = vector.load %arg1[%c0, %c0_0, %c0_1] : memref<2x1x36xf32, #tpu.memory_space<vmem>>, vector<2x1x36xf32>
    %c0_2 = arith.constant 0 : index
    %c0_3 = arith.constant 0 : index
    %1 = vector.load %arg2[%c0_2, %c0_3] : memref<16x36xf32, #tpu.memory_space<vmem>>, vector<16x36xf32>
    %2 = vector.shape_cast %1 : vector<16x36xf32> to vector<1x16x36xf32>
    %3 = vector.broadcast %0 : vector<2x1x36xf32> to vector<2x16x36xf32>
    %4 = vector.broadcast %2 : vector<1x16x36xf32> to vector<2x16x36xf32>
    %5 = arith.mulf %3, %4 : vector<2x16x36xf32>
    %c0_4 = arith.constant 0 : index
    %c0_5 = arith.constant 0 : index
    %6 = vector.load %arg3[%c0_4, %c0_5] : memref<16x36xf32, #tpu.memory_space<vmem>>, vector<16x36xf32>
    %7 = vector.shape_cast %6 : vector<16x36xf32> to vector<1x16x36xf32>
    %8 = vector.broadcast %7 : vector<1x16x36xf32> to vector<2x16x36xf32>
    %9 = arith.addf %5, %8 : vector<2x16x36xf32>
    %c0_6 = arith.constant 0 : index
    %c0_7 = arith.constant 0 : index
    %c0_8 = arith.constant 0 : index
    %10 = vector.load %arg4[%c0_6, %c0_7, %c0_8] : memref<2x16x36xf32, #tpu.memory_space<vmem>>, vector<2x16x36xf32>
    tpu.vector_store %arg4[%c0_6, %c0_7, %c0_8], %9 {strides = array<i32>} : memref<2x16x36xf32, #tpu.memory_space<vmem>>, vector<2x16x36xf32>,
    return
  }
  func.func @transform_0(%arg0: i32) -> (i32, i32, i32) {
    %c0_i32 = arith.constant 0 : i32
    %c0_i32_0 = arith.constant 0 : i32
    %c0_i32_1 = arith.constant 0 : i32
    return %arg0, %c0_i32, %c0_i32_0 : i32, i32, i32
  }
  func.func @transform_1(%arg0: i32) -> (i32, i32) {
    %c0_i32 = arith.constant 0 : i32
    %c0_i32_0 = arith.constant 0 : i32
    %c0_i32_1 = arith.constant 0 : i32
    return %c0_i32, %c0_i32_0 : i32, i32
  }
  func.func @transform_2(%arg0: i32) -> (i32, i32) {
    %c0_i32 = arith.constant 0 : i32
    %c0_i32_0 = arith.constant 0 : i32
    %c0_i32_1 = arith.constant 0 : i32
    return %c0_i32, %c0_i32_0 : i32, i32
  }
  func.func @transform_3(%arg0: i32) -> (i32, i32, i32) {
    %c0_i32 = arith.constant 0 : i32
    %c0_i32_0 = arith.constant 0 : i32
    %c0_i32_1 = arith.constant 0 : i32
    return %arg0, %c0_i32, %c0_i32_0 : i32, i32, i32
  }
}

</mosaic_0001>

<bundles_post_ra>
// kernel: tpu_custom_call.1
= control target key start
LH: loop header
LB: loop body
LE: loop exit
PB: predicated region body
PF: predicated region fallthrough
CT: control target
= control target key end

     0   :  { %8 = vsyncpa [#allocation3], 0  ;;  %s294_s0 = inlined_call_operand.hbm [shape: f32[2,1,36], index: 0, kind: input, shape index: {}]   ;;  %s295_s1 = inlined_call_operand.hbm [shape: f32[16,36], index: 1, kind: input, shape index: {}]   ;;  %s296_s2 = inlined_call_operand.hbm [shape: f32[16,36], index: 2, kind: input, shape index: {}]   ;;  %s297_s3 = inlined_call_operand.hbm [shape: f32[2,16,36], index: 3, kind: output, shape index: {}]  }
   0x1   :  { %9 = vsyncpa [#allocation6], 0 }
   0x2   :  { %10 = vsyncpa [#allocation4], 0  ;;  %s209_s12 = smov [#allocation5]   ;;  %s115_s16 = scalar_lea.hbm %s295_s1, 256 }
   0x3   :  { %s28_s13 = sshll.u32 %s209_s12, 4  ;;  %p116_p0 = scmp.ne.s32.totalorder %s295_s1, %s115_s16  ;;  %s29_s13 = int_to_ptr.vmem [resolvable:$true] %s28_s13 }
   0x4   :  { %p119_p1 = scmp.lt.u32.totalorder %s115_s16, %s295_s1 }
   0x6   :  { %p121_p2 = pnand %p119_p1, %p116_p0 }
   0x8   :  { %124 = shalt.err (!%p121_p2)
}
   0x9   :  { %s125_s21 = scalar_lea.vmem %s29_s13, 256  ;;  %p130_p4 = scmp.lt.s32.totalorder %s29_s13, %s29_s13 }
   0xa   :  { %p126_p3 = scmp.ne.s32.totalorder %s29_s13, %s125_s21  ;;  %p131_p5 = scmp.lt.s32.totalorder %s125_s21, %s125_s21 }
   0xc   :  { %p132_p6 = por %p131_p5, %p130_p4 }
   0xe   :  { %p133_p7 = pnand %p132_p6, %p126_p3 }
  0x10   :  { %136 = shalt.err (!%p133_p7)
}
  0x11   :  { %s210_s22 = smov 128   ;;  %s211_s23 = smov 8  }
  0x12   :  { %34 = dma.hbm_to_vmem [thread:$0]  %s295_s1, 256, %s29_s13, [#allocation6], %s210_s22, %s210_s22, %s211_s23  }
  0x13   :  { %s212_s26 = smov [#allocation2]   ;;  %s137_s30 = scalar_lea.hbm %s294_s0, 32 }
  0x14   :  { %s16_s27 = sshll.u32 %s212_s26, 4  ;;  %p138_p8 = scmp.ne.s32.totalorder %s294_s0, %s137_s30  ;;  %s17_s27 = int_to_ptr.vmem [resolvable:$true] %s16_s27 }
  0x15   :  { %p141_p9 = scmp.lt.u32.totalorder %s137_s30, %s294_s0 }
  0x17   :  { %p143_p10 = pnand %p141_p9, %p138_p8 }
  0x19   :  { %146 = shalt.err (!%p143_p10)
}
  0x1a   :  { %s147_s8 = scalar_lea.vmem %s17_s27, 32  ;;  %p152_p12 = scmp.lt.s32.totalorder %s17_s27, %s17_s27 }
  0x1b   :  { %p148_p11 = scmp.ne.s32.totalorder %s17_s27, %s147_s8  ;;  %p153_p13 = scmp.lt.s32.totalorder %s147_s8, %s147_s8 }
  0x1d   :  { %p154_p0 = por %p153_p13, %p152_p12 }
  0x1f   :  { %p155_p1 = pnand %p154_p0, %p148_p11 }
  0x21   :  { %158 = shalt.err (!%p155_p1)
}
  0x22   :  { %s213_s1 = smov 16   ;;  %s214_s9 = smov 1  }
  0x23   :  { %22 = dma.hbm_to_vmem [thread:$0]  %s294_s0, 32, %s17_s27, [#allocation3], %s213_s1, %s213_s1, %s214_s9  }
  0x24   :  { %s215_s12 = smov [#allocation7]   ;;  %s159_s16 = scalar_lea.hbm %s296_s2, 256 }
  0x25   :  { %s40_s13 = sshll.u32 %s215_s12, 4  ;;  %p160_p2 = scmp.ne.s32.totalorder %s296_s2, %s159_s16  ;;  %s41_s13 = int_to_ptr.vmem [resolvable:$true] %s40_s13 }
  0x26   :  { %p163_p3 = scmp.lt.u32.totalorder %s159_s16, %s296_s2 }
  0x28   :  { %p165_p4 = pnand %p163_p3, %p160_p2 }
  0x2a   :  { %168 = shalt.err (!%p165_p4)
}
  0x2b   :  { %s169_s21 = scalar_lea.vmem %s41_s13, 256  ;;  %p174_p6 = scmp.lt.s32.totalorder %s41_s13, %s41_s13 }
  0x2c   :  { %p170_p5 = scmp.ne.s32.totalorder %s41_s13, %s169_s21  ;;  %p175_p7 = scmp.lt.s32.totalorder %s169_s21, %s169_s21 }
  0x2e   :  { %p176_p8 = por %p175_p7, %p174_p6 }
  0x30   :  { %p177_p9 = pnand %p176_p8, %p170_p5 }
  0x32   :  { %180 = shalt.err (!%p177_p9)
}
  0x33   :  { %46 = dma.hbm_to_vmem [thread:$0]  %s296_s2, 256, %s41_s13, [#allocation6], %s210_s22, %s210_s22, %s211_s23  }
  0x34   :  { %203 = dma.done.wait [#allocation3], 32  }
  0x35   :  { %204 = vsyncadd [#allocation3], 4294967264 }
  0x36   :  { %205 = dma.done.wait [#allocation6], 512  }
  0x37   :  { %206 = vsyncadd [#allocation6], 4294966784  ;;  %v105_v0 = vld [vmem:[#allocation2] ss:$0 sm:$0xff]  ;;  %v58_v1 = vld [vmem:[#allocation5] sm:$0xff]  ;;  %s216_s25 = smov [#allocation8]  }
  0x38   :  { %v76_v2 = vld [vmem:[#allocation7] sm:$0xff]  ;;  %v72_v3 = vmul.f32 %v105_v0, %v58_v1  ;;  %v59_v4 = vld [vmem:[#allocation5 + $0x8] sm:$0xff]  ;;  %v77_v5 = vld [vmem:[#allocation7 + $0x8] sm:$0xff]  ;;  %s92_s26 = sshll.u32 %s216_s25, 4  ;;  %vm82_vm0 = vcmask 293888   ;;  %s93_s26 = int_to_ptr.vmem [resolvable:$true] %s92_s26 }
  0x39   :  { %v106_v6 = vld [vmem:[#allocation2 + $0x1] ss:$0 sm:$0xff]  ;;  %v73_v7 = vmul.f32 %v105_v0, %v59_v4  ;;  %s181_s2 = scalar_lea.vmem %s93_s26, 512  ;;  %p186_p11 = scmp.lt.s32.totalorder %s93_s26, %s93_s26 }
  0x3a   :  { %v74_v8 = vmul.f32 %v106_v6, %v58_v1  ;;  %v75_v9 = vmul.f32 %v106_v6, %v59_v4  ;;  %v78_v10 = vadd.f32 %v76_v2, %v72_v3  ;;  %p182_p10 = scmp.ne.s32.totalorder %s93_s26, %s181_s2  ;;  %p187_p12 = scmp.lt.s32.totalorder %s181_s2, %s181_s2 }
  0x3b   :  { %v79_v11 = vadd.f32 %v77_v5, %v73_v7 }
  0x3c   :  { %v80_v12 = vadd.f32 %v76_v2, %v74_v8  ;;  %v81_v13 = vadd.f32 %v77_v5, %v75_v9  ;;  %83 = vst.msk [vmem:[#allocation8] sm:$0xff] %vm82_vm0, %v78_v10  ;;  %p188_p13 = por %p187_p12, %p186_p11 }
  0x3d   :  { %84 = vst.msk [vmem:[#allocation8 + $0x8] sm:$0xff] %vm82_vm0, %v79_v11 }
  0x3e   :  { %85 = vst.msk [vmem:[#allocation8 + $0x10] sm:$0xff] %vm82_vm0, %v80_v12  ;;  %86 = vst.msk [vmem:[#allocation8 + $0x18] sm:$0xff] %vm82_vm0, %v81_v13  ;;  %p189_p0 = pnand %p188_p13, %p182_p10 }
  0x40   :  { %192 = shalt.err (!%p189_p0)
}
  0x41   :  { %s193_s29 = scalar_lea.hbm %s297_s3, 512 }
  0x42   :  { %p194_p1 = scmp.ne.s32.totalorder %s297_s3, %s193_s29  ;;  %p197_p2 = scmp.lt.u32.totalorder %s193_s29, %s297_s3 }
  0x44   :  { %p199_p3 = pnand %p197_p2, %p194_p1 }
  0x46   :  { %202 = shalt.err (!%p199_p3)
}
  0x47   :  { %98 = dma.vmem_to_hbm [thread:$0]  %s93_s26, 512, %s297_s3, [#allocation4], %s210_s22, %s210_s22, %s211_s23  }
  0x48   :  { %207 = dma.done.wait [#allocation4], 512  }
  0x49   :  { %208 = vsyncadd [#allocation4], 4294966784 }
  0x4a   :  { %102 = vsyncpa [#allocation3], 1 }
  0x4b   :  { %103 = vsyncpa [#allocation6], 1 }
  0x4c   :  { %104 = vsyncpa [#allocation4], 1 }

</bundles_post_ra>
